<compile_context>
chip_gen: v6e
topology: v6e:2x2x1
jax: 0.10.0
libtpu: 0.0.40
codegen_flags: <defaults>
</compile_context>

<pallas_src>
import functools

import jax
import jax.numpy as jnp
from jax import lax
from jax.experimental import pallas as pl
from jax.experimental.pallas import tpu as pltpu


def _round_up(x, m):
    return ((x + m - 1) // m) * m


def _stats_kernel(wt_ref, xt_ref, center_ref, sum_ref, sq_ref, *, m_true, tile_m):
    """Accumulate per-j sum(d) and sum(d*d), d = (W^T @ x_tile) - center, over all M tiles."""
    i = pl.program_id(0)

    @pl.when(i == 0)
    def _init():
        sum_ref[...] = jnp.zeros_like(sum_ref)
        sq_ref[...] = jnp.zeros_like(sq_ref)

    # (J, Cin) @ (Cin, TM) -> (J, TM); M on the lane axis (dense loads / reduces).
    y = jnp.dot(wt_ref[...], xt_ref[...], preferred_element_type=jnp.float32)
    d = y - center_ref[...]                                   # center is (J, 1), lane-broadcast
    # Mask columns that belong to the zero-padded tail of M so they don't pollute stats.
    col = i * tile_m + lax.broadcasted_iota(jnp.int32, d.shape, 1)
    d = jnp.where(col < m_true, d, 0.0)
    sum_ref[...] += jnp.sum(d, axis=1, keepdims=True)          # (J, 1)
    sq_ref[...] += jnp.sum(d * d, axis=1, keepdims=True)       # (J, 1)


def _apply_kernel(wt_ref, xt_ref, scale_ref, shift_ref, o_ref):
    """Recompute the cheap matmul and apply the fused BN affine + ReLU, lane-dense store."""
    y = jnp.dot(wt_ref[...], xt_ref[...], preferred_element_type=jnp.float32)   # (J, TM)
    o_ref[...] = jnp.maximum(y * scale_ref[...] + shift_ref[...], 0.0)


def deconv2d_forward(x, weight, bias, gamma, beta, eps=1e-5, tile_m=2048):
    """x: (N, Cin, H, W); weight: (Cin, Cout, KH, KW) (PyTorch ConvTranspose2d layout)."""
    del bias  # mathematically absorbed by train-mode BatchNorm (mean subtraction); dead work.
    N, Cin, H, W = x.shape
    _, Cout, KH, KW = weight.shape
    KK = KH * KW
    J = KK * Cout
    M = N * H * W

    # --- plain-XLA layout glue (lane-dense kernel layouts) ---
    # x_t[ci, m]  with m = ((n*H)+h)*W + w
    x_t = jnp.transpose(x.astype(jnp.float32), (1, 0, 2, 3)).reshape(Cin, M)
    # w_t[j, ci]  with j = (kh*KW + kw)*Cout + co
    w_t = jnp.transpose(weight.astype(jnp.float32), (2, 3, 1, 0)).reshape(J, Cin)

    # M-tile: multiple of 128 lanes; small per-tile VMEM footprint so the default
    # scoped-VMEM limit is fine on v5e/v6e and the 64 MiB v7x.
    tm = _round_up(min(int(tile_m), _round_up(M, 128)), 128)
    m_pad = _round_up(M, tm)
    if m_pad != M:
        x_t = jnp.pad(x_t, ((0, 0), (0, m_pad - M)))
    num_tiles = m_pad // tm

    stats_call = pl.pallas_call(
        functools.partial(_stats_kernel, m_true=M, tile_m=tm),
        out_shape=(jax.ShapeDtypeStruct((J, 1), jnp.float32),
                   jax.ShapeDtypeStruct((J, 1), jnp.float32)),
        grid=(num_tiles,),
        in_specs=[
            pl.BlockSpec((J, Cin), lambda i: (0, 0)),
            pl.BlockSpec((Cin, tm), lambda i: (0, i)),
            pl.BlockSpec((J, 1), lambda i: (0, 0)),
        ],
        out_specs=(pl.BlockSpec((J, 1), lambda i: (0, 0)),
                   pl.BlockSpec((J, 1), lambda i: (0, 0))),
        compiler_params=pltpu.CompilerParams(
            dimension_semantics=("arbitrary",)),       # resident accumulator across M tiles
    )

    count = float(M * KK)                               # elements per channel = N * OH * OW
    inv_count = 1.0 / count                             # hoisted reciprocal

    # Pass 1: per-j sums -> per-channel mean.
    zero_center = jnp.zeros((J, 1), jnp.float32)
    sum_j, _ = stats_call(w_t, x_t, zero_center)
    mean_c = jnp.sum(sum_j.reshape(KK, Cout), axis=0) * inv_count           # (Cout,)

    # Pass 2: centered sum of squares -> biased variance (no E[y^2]-mean^2 cancellation).
    center_j = jnp.tile(mean_c, KK).reshape(J, 1)
    _, sq_j = stats_call(w_t, x_t, center_j)
    var_c = jnp.sum(sq_j.reshape(KK, Cout), axis=0) * inv_count             # (Cout,)

    scale_c = gamma.astype(jnp.float32) * lax.rsqrt(var_c + eps)
    shift_c = beta.astype(jnp.float32) - mean_c * scale_c
    scale_j = jnp.tile(scale_c, KK).reshape(J, 1)
    shift_j = jnp.tile(shift_c, KK).reshape(J, 1)

    # Pass 3: apply fused affine + ReLU, writing the lane-dense (J, M) output.
    o_mat = pl.pallas_call(
        _apply_kernel,
        out_shape=jax.ShapeDtypeStruct((J, m_pad), jnp.float32),
        grid=(num_tiles,),
        in_specs=[
            pl.BlockSpec((J, Cin), lambda i: (0, 0)),
            pl.BlockSpec((Cin, tm), lambda i: (0, i)),
            pl.BlockSpec((J, 1), lambda i: (0, 0)),
            pl.BlockSpec((J, 1), lambda i: (0, 0)),
        ],
        out_specs=pl.BlockSpec((J, tm), lambda i: (0, i)),
        compiler_params=pltpu.CompilerParams(
            dimension_semantics=("parallel",)),         # shards the store-bound loop on v7x
    )(w_t, x_t, scale_j, shift_j)

    # --- plain-XLA layout glue back to the module's NCHW output ---
    # TODO(synk): if the consumer accepts NHWC/channel-major, this relayout pass can be dropped;
    # NCHW is not expressible as a rectangular block of the kernel's lane-dense tiles.
    o_mat = o_mat[:, :M]
    out = o_mat.reshape(KH, KW, Cout, N, H, W)
    out = jnp.transpose(out, (3, 2, 4, 0, 5, 1)).reshape(N, Cout, H * KH, W * KW)
    return out


def _reference(x, weight, bias, gamma, beta, eps=1e-5):
    """Independent pure-JAX reference of ConvTranspose2d(k=2,s=2,bias) + BN(train) + ReLU."""
    N, Cin, H, W = x.shape
    _, Cout, KH, KW = weight.shape
    out = jnp.zeros((N, Cout, H * KH, W * KW), jnp.float32)
    for kh in range(KH):
        for kw in range(KW):
            contrib = jnp.einsum("nihw,io->nohw", x, weight[:, :, kh, kw])
            contrib = contrib + bias[None, :, None, None]
            out = out.at[:, :, kh::KH, kw::KW].set(contrib)
    mean = out.mean(axis=(0, 2, 3), keepdims=True)
    var = ((out - mean) ** 2).mean(axis=(0, 2, 3), keepdims=True)   # biased
    out = (out - mean) * lax.rsqrt(var + eps)
    out = out * gamma[None, :, None, None] + beta[None, :, None, None]
    return jnp.maximum(out, 0.0)


if __name__ == "__main__":
    # small shapes: batch=2, in_channels=4, out_channels=8, spatial=16x16
    N, Cin, Cout, H, W = 2, 4, 8, 16, 16
    key = jax.random.PRNGKey(0)
    kx, kw, kb = jax.random.split(key, 3)

    x = jax.random.normal(kx, (N, Cin, H, W), jnp.float32)
    weight = jax.random.normal(kw, (Cin, Cout, 2, 2), jnp.float32) * 0.1   # ConvTranspose2d weight
    bias = jax.random.normal(kb, (Cout,), jnp.float32) * 0.1               # ConvTranspose2d bias
    gamma = jnp.ones((Cout,), jnp.float32)                                  # BN weight (default)
    beta = jnp.zeros((Cout,), jnp.float32)                                  # BN bias (default)

    # tile_m=128 -> 4-tile grid at toy scale, exercising the tiled accumulator path.
    out = deconv2d_forward(x, weight, bias, gamma, beta, tile_m=128)
    out = jax.block_until_ready(out)

    ref = _reference(x, weight, bias, gamma, beta)
    assert out.shape == (N, Cout, 2 * H, 2 * W), out.shape
    assert jnp.allclose(out, ref, atol=1e-4, rtol=1e-4), float(jnp.abs(out - ref).max())

    print("KERNEL_OK")
</pallas_src>

<mosaic_0001>
module attributes {stable_mosaic.version = 11 : i64} {
  func.func @_stats_kernel(%arg0: i32, %arg1: memref<32x4xf32, #tpu.memory_space<vmem>>, %arg2: memref<4x128xf32, #tpu.memory_space<vmem>>, %arg3: memref<32x1xf32, #tpu.memory_space<vmem>>, %arg4: memref<32x1xf32, #tpu.memory_space<vmem>>, %arg5: memref<32x1xf32, #tpu.memory_space<vmem>>) attributes {dimension_semantics = [#tpu.dimension_semantics<arbitrary>], iteration_bounds = array<i64: 4>, scalar_prefetch = 0 : i64, scratch_operands = 0 : i64, tpu.core_type = #tpu.core_type<tc>, window_params = [{pipeline_mode = #tpu.pipeline_mode<synchronous>, transform_indices = @transform_0, window_bounds = array<i64: 32, 4>}, {transform_indices = @transform_1, window_bounds = array<i64: 4, 128>}, {pipeline_mode = #tpu.pipeline_mode<synchronous>, transform_indices = @transform_2, window_bounds = array<i64: 32, 1>}, {pipeline_mode = #tpu.pipeline_mode<synchronous>, transform_indices = @transform_3, window_bounds = array<i64: 32, 1>}, {pipeline_mode = #tpu.pipeline_mode<synchronous>, transform_indices = @transform_4, window_bounds = array<i64: 32, 1>}]} {
    %c0_i32 = arith.constant 0 : i32
    %0 = arith.cmpi eq, %arg0, %c0_i32 : i32
    %1 = arith.extui %0 : i1 to i32
    %c0_i32_0 = arith.constant 0 : i32
    %2 = arith.cmpi ne, %1, %c0_i32_0 : i32
    scf.if %2 {
      %cst_17 = arith.constant 0.000000e+00 : f32
      %28 = vector.broadcast %cst_17 : f32 to vector<32x1xf32>
      %c0_18 = arith.constant 0 : index
      %c0_19 = arith.constant 0 : index
      %29 = vector.load %arg4[%c0_18, %c0_19] : memref<32x1xf32, #tpu.memory_space<vmem>>, vector<32x1xf32>
      tpu.vector_store %arg4[%c0_18, %c0_19], %28 {strides = array<i32>} : memref<32x1xf32, #tpu.memory_space<vmem>>, vector<32x1xf32>,
      %cst_20 = arith.constant 0.000000e+00 : f32
      %30 = vector.broadcast %cst_20 : f32 to vector<32x1xf32>
      %c0_21 = arith.constant 0 : index
      %c0_22 = arith.constant 0 : index
      %31 = vector.load %arg5[%c0_21, %c0_22] : memref<32x1xf32, #tpu.memory_space<vmem>>, vector<32x1xf32>
      tpu.vector_store %arg5[%c0_21, %c0_22], %30 {strides = array<i32>} : memref<32x1xf32, #tpu.memory_space<vmem>>, vector<32x1xf32>,
    } else {
    }
    %c0 = arith.constant 0 : index
    %c0_1 = arith.constant 0 : index
    %3 = vector.load %arg1[%c0, %c0_1] : memref<32x4xf32, #tpu.memory_space<vmem>>, vector<32x4xf32>
    %c0_2 = arith.constant 0 : index
    %c0_3 = arith.constant 0 : index
    %4 = vector.load %arg2[%c0_2, %c0_3] : memref<4x128xf32, #tpu.memory_space<vmem>>, vector<4x128xf32>
    %cst = arith.constant dense<0.000000e+00> : vector<32x128xf32>
    %5 = tpu.matmul %3, %4, %cst {dimension_numbers = #tpu.dot_dimension_numbers<[1], [0], [0], [1], [0, 0, 1, 1], [], []>} : vector<32x4xf32>, vector<4x128xf32>, vector<32x128xf32> -> vector<32x128xf32>
    %c0_4 = arith.constant 0 : index
    %c0_5 = arith.constant 0 : index
    %6 = vector.load %arg3[%c0_4, %c0_5] : memref<32x1xf32, #tpu.memory_space<vmem>>, vector<32x1xf32>
    %7 = vector.broadcast %6 : vector<32x1xf32> to vector<32x128xf32>
    %8 = arith.subf %5, %7 : vector<32x128xf32>
    %c128_i32 = arith.constant 128 : i32
    %9 = arith.muli %arg0, %c128_i32 : i32
    %10 = tpu.iota {dimensions = array<i32: 1>} : vector<32x128xi32>
    %11 = vector.broadcast %9 : i32 to vector<32x128xi32>
    %12 = arith.addi %11, %10 : vector<32x128xi32>
    %c512_i32 = arith.constant 512 : i32
    %13 = vector.broadcast %c512_i32 : i32 to vector<32x128xi32>
    %14 = arith.cmpi slt, %12, %13 : vector<32x128xi32>
    %cst_6 = arith.constant 0.000000e+00 : f32
    %15 = vector.broadcast %cst_6 : f32 to vector<32x128xf32>
    %16 = arith.select %14, %8, %15 : vector<32x128xi1>, vector<32x128xf32>
    %c0_7 = arith.constant 0 : index
    %c0_8 = arith.constant 0 : index
    %17 = vector.load %arg4[%c0_7, %c0_8] : memref<32x1xf32, #tpu.memory_space<vmem>>, vector<32x1xf32>
    %cst_9 = arith.constant dense<0.000000e+00> : vector<32xf32>
    %18 = vector.multi_reduction <add>, %16, %cst_9 [1] : vector<32x128xf32> to vector<32xf32>
    %19 = vector.shape_cast %18 : vector<32xf32> to vector<32x1xf32>
    %20 = arith.addf %17, %19 : vector<32x1xf32>
    %c0_10 = arith.constant 0 : index
    %c0_11 = arith.constant 0 : index
    %21 = vector.load %arg4[%c0_10, %c0_11] : memref<32x1xf32, #tpu.memory_space<vmem>>, vector<32x1xf32>
    tpu.vector_store %arg4[%c0_10, %c0_11], %20 {strides = array<i32>} : memref<32x1xf32, #tpu.memory_space<vmem>>, vector<32x1xf32>,
    %c0_12 = arith.constant 0 : index
    %c0_13 = arith.constant 0 : index
    %22 = vector.load %arg5[%c0_12, %c0_13] : memref<32x1xf32, #tpu.memory_space<vmem>>, vector<32x1xf32>
    %23 = arith.mulf %16, %16 : vector<32x128xf32>
    %cst_14 = arith.constant dense<0.000000e+00> : vector<32xf32>
    %24 = vector.multi_reduction <add>, %23, %cst_14 [1] : vector<32x128xf32> to vector<32xf32>
    %25 = vector.shape_cast %24 : vector<32xf32> to vector<32x1xf32>
    %26 = arith.addf %22, %25 : vector<32x1xf32>
    %c0_15 = arith.constant 0 : index
    %c0_16 = arith.constant 0 : index
    %27 = vector.load %arg5[%c0_15, %c0_16] : memref<32x1xf32, #tpu.memory_space<vmem>>, vector<32x1xf32>
    tpu.vector_store %arg5[%c0_15, %c0_16], %26 {strides = array<i32>} : memref<32x1xf32, #tpu.memory_space<vmem>>, vector<32x1xf32>,
    return
  }
  func.func @transform_0(%arg0: i32) -> (i32, i32) {
    %c0_i32 = arith.constant 0 : i32
    %c0_i32_0 = arith.constant 0 : i32
    %c0_i32_1 = arith.constant 0 : i32
    return %c0_i32, %c0_i32_0 : i32, i32
  }
  func.func @transform_1(%arg0: i32) -> (i32, i32) {
    %c0_i32 = arith.constant 0 : i32
    %c0_i32_0 = arith.constant 0 : i32
    return %c0_i32, %arg0 : i32, i32
  }
  func.func @transform_2(%arg0: i32) -> (i32, i32) {
    %c0_i32 = arith.constant 0 : i32
    %c0_i32_0 = arith.constant 0 : i32
    %c0_i32_1 = arith.constant 0 : i32
    return %c0_i32, %c0_i32_0 : i32, i32
  }
  func.func @transform_3(%arg0: i32) -> (i32, i32) {
    %c0_i32 = arith.constant 0 : i32
    %c0_i32_0 = arith.constant 0 : i32
    %c0_i32_1 = arith.constant 0 : i32
    return %c0_i32, %c0_i32_0 : i32, i32
  }
  func.func @transform_4(%arg0: i32) -> (i32, i32) {
    %c0_i32 = arith.constant 0 : i32
    %c0_i32_0 = arith.constant 0 : i32
    %c0_i32_1 = arith.constant 0 : i32
    return %c0_i32, %c0_i32_0 : i32, i32
  }
}

</mosaic_0001>

<bundles_post_ra>
// kernel: tpu_custom_call.1
= control target key start
LH: loop header
LB: loop body
LE: loop exit
PB: predicated region body
PF: predicated region fallthrough
CT: control target
= control target key end

     0   :  { %s491_s15 = smov 0   ;;  %s615_s0 = inlined_call_operand.vmem [shape: f32[32,4], index: 0, kind: input, shape index: {}]   ;;  %s616_s1 = inlined_call_operand.vmem [shape: f32[4,512], index: 1, kind: input, shape index: {}]   ;;  %s617_s2 = inlined_call_operand.vmem [shape: f32[32,1], index: 2, kind: input, shape index: {}]   ;;  %s618_s3 = inlined_call_operand.vmem [shape: f32[32,1], index: 3, kind: output, shape index: {0}]   ;;  %s619_s4 = inlined_call_operand.vmem [shape: f32[32,1], index: 4, kind: output, shape index: {1}]  }
   0x1 LB: > { %s497_s16 = sadd.s32 4294967295, %s462_s15   ;;  %p418_p0 = scmp.ge.s32.totalorder %s462_s15, 1  ;;  %s462_s15 = sphi %s491_s15, %s15_s15  }
   0x2   : > { %p154_p1 = scmp.lt.s32.totalorder %s462_s15, 5 }
   0x4   : > { %p155_p2 = pnand %p418_p0, %p154_p1 }
   0x5   : > { %p174_p3 = scmp.lt.s32.totalorder (!%p155_p2), %s497_s16, 3  ;;  %p420_p4 = scmp.ne.s32.totalorder (!%p155_p2), %s497_s16, 0 }
   0x6   : > { %158 = sbr.rel (%p155_p2) target bundleno = 379 (0x17b), region = 32 }
   0xb   : > { %s175_s17 = scalar_select %p174_p3, %s497_s16, 3 }
   0xc   : > { %181 = sbr.rel (%p420_p4) target bundleno = 22 (0x16), region = 36 }
   0xd   : > { %s419_s18 = sshll.u32 %s175_s17, 2 }
   0xe   : > { %s177_s21 = scalar_lea.vmem %s616_s1, %s419_s18 }
  0x11   : > { %vm182_vm0 = vcmask 7168   ;;  %v464_v0 = vmov 0.0  }
  0x12   : > { %183 = vst.msk [vmem:[%s618_s3] sm:$0xff] %vm182_vm0, %v464_v0  ;;  %184 = vst.msk [vmem:[%s618_s3 + $0x8] sm:$0xff] %vm182_vm0, %v464_v0 }
  0x13   : > { %185 = vst.msk [vmem:[%s618_s3 + $0x10] sm:$0xff] %vm182_vm0, %v464_v0  ;;  %186 = vst.msk [vmem:[%s618_s3 + $0x18] sm:$0xff] %vm182_vm0, %v464_v0 }
  0x14   : > { %187 = vst.msk [vmem:[%s619_s4] sm:$0xff] %vm182_vm0, %v464_v0  ;;  %188 = vst.msk [vmem:[%s619_s4 + $0x8] sm:$0xff] %vm182_vm0, %v464_v0 }
  0x15   : > { %189 = vst.msk [vmem:[%s619_s4 + $0x10] sm:$0xff] %vm182_vm0, %v464_v0  ;;  %190 = vst.msk [vmem:[%s619_s4 + $0x18] sm:$0xff] %vm182_vm0, %v464_v0 }
  0x16 PF: > { %v195_v1 = vld [vmem:[%s177_s21] sm:$0xf]  ;;  %vm209_vm1 = vcmask 1043456   ;;  %vm196_vm2 = vcmask 31744   ;;  %v193_v3 = vld [vmem:[%s615_s0 + $0x10] sm:$0xff]  ;;  %v192_v4 = vld [vmem:[%s615_s0 + $0x8] sm:$0xff]  ;;  %v327_v11 = vlaneseq }
  0x17   : > { %v191_v2 = vld [vmem:[%s615_s0] sm:$0xff]  ;;  %434 = vmatprep.subr.msk.mxu0 %vm209_vm1, %v195_v1  ;;  %442 = vmatprep.subr.msk.mxu1 %vm209_vm1, %v195_v1  ;;  %v194_v5 = vld [vmem:[%s615_s0 + $0x18] sm:$0xff]  ;;  %v300_v6 = vld [vmem:[%s617_s2 + $0x10] sm:$0xff]  ;;  %v465_v8 = vmov 0   ;;  %s426_s30 = sshll.u32 %s497_s16, 7  ;;  %vm352_vm4 = vcmask 7168  }
  0x18   : > { %435 = vmatpush3.msk.msra.mxu0 %vm209_vm1, %v195_v1  ;;  %443 = vmatpush3.msk.msra.mxu1 %vm209_vm1, %v195_v1  ;;  %v298_v7 = vld [vmem:[%s617_s2] sm:$0xff]  ;;  %v301_v9 = vld [vmem:[%s617_s2 + $0x18] sm:$0xff]  ;;  %v299_v10 = vld [vmem:[%s617_s2 + $0x8] sm:$0xff]  ;;  %v328_v13 = vand.u32 127, %v327_v11  ;;  %v329_v15 = vstv %s426_s30 }
  0x19   : > { %436 = vmatprep.mubr.msk.f32.mxu0 %vm196_vm2, %v191_v2  ;;  %439 = vmatprep.mubr.msk.f32.mxu1 %vm196_vm2, %v193_v3  ;;  %v337_v36 = vld [vmem:[%s618_s3 + $0x8] sm:$0xff]  ;;  %v336_v41 = vld [vmem:[%s618_s3] sm:$0xff] }
  0x1a   : > { %437 = vmatmul.mubr.msk.f32.vlgmr.msra.gmra.mxu0 %vm196_vm2, %v192_v4  ;;  %440 = vmatmul.mubr.msk.f32.vlgmr.msra.gmra.mxu1 %vm196_vm2, %v194_v5  ;;  %v330_v16 = vadd.s32 %v329_v15, %v328_v13  ;;  %v339_v35 = vld [vmem:[%s618_s3 + $0x18] sm:$0xff]  ;;  %v338_v47 = vld [vmem:[%s618_s3 + $0x10] sm:$0xff] }
  0x1b   : > { %455 = vset.pattern.permute.xlu1 %v465_v8  ;;  %454 = vset.pattern.permute.xlu0 %v465_v8  ;;  %v357_v42 = vld [vmem:[%s619_s4] sm:$0xff]  ;;  %v358_v53 = vld [vmem:[%s619_s4 + $0x8] sm:$0xff] }
  0x1c   : > { %314 = vperm.xlu1 %455, %v300_v6   ;;  %304 = vperm.xlu0 %454, %v298_v7   ;;  %vm331_vm3 = vcmp.lt.s32.totalorder %v330_v16, 512  ;;  %v359_v48 = vld [vmem:[%s619_s4 + $0x10] sm:$0xff]  ;;  %v360_v56 = vld [vmem:[%s619_s4 + $0x18] sm:$0xff] }
  0x20   : > { %319 = vperm.xlu1 %455, %v301_v9   ;;  %309 = vperm.xlu0 %454, %v299_v10  }
  0x97   : > { %v305_v12 = vpop.permute.xlu0 %304  ;;  %v315_v14 = vpop.permute.xlu1 %314 }
  0x9b   : > { %v310_v17 = vpop.permute.xlu0 %309  ;;  %v320_v18 = vpop.permute.xlu1 %319 }
  0xda   : > { %v438_v19 = vpop.f32.mrf.mxu0  ;;  %v441_v20 = vpop.f32.mrf.mxu1 }
  0xdb   : > { %v323_v21 = vsub.f32 %v438_v19, %v310_v17  ;;  %v325_v22 = vsub.f32 %v441_v20, %v320_v18 }
  0xdc   : > { %v279_v23 = vpop.f32.mrf.mxu0  ;;  %v289_v24 = vpop.f32.mrf.mxu1 }
  0xdd   : > { %v322_v25 = vsub.f32 %v279_v23, %v305_v12  ;;  %v324_v26 = vsub.f32 %v289_v24, %v315_v14  ;;  %v335_v27 = vsel %vm331_vm3, %v325_v22, 0.0  ;;  %v333_v28 = vsel %vm331_vm3, %v323_v21, 0.0 }
  0xde   : > { %346 = vadd.xlane.f32.xlu0 %v335_v27  ;;  %342 = vadd.xlane.f32.xlu1 %v333_v28  ;;  %v362_v33 = vmul.f32 %v333_v28, %v333_v28  ;;  %v364_v34 = vmul.f32 %v335_v27, %v335_v27 }
  0xdf   : > { %v332_v29 = vsel %vm331_vm3, %v322_v25, 0.0  ;;  %v334_v31 = vsel %vm331_vm3, %v324_v26, 0.0 }
  0xe0   : > { %v361_v30 = vmul.f32 %v332_v29, %v332_v29  ;;  %v363_v32 = vmul.f32 %v334_v31, %v334_v31 }
  0xe2   : > { %340 = vadd.xlane.f32.xlu0 %v332_v29  ;;  %365 = vadd.xlane.f32.xlu1 %v361_v30 }
  0xe6   : > { %344 = vadd.xlane.f32.xlu0 %v334_v31  ;;  %369 = vadd.xlane.f32.xlu1 %v363_v32 }
  0xea   : > { %367 = vadd.xlane.f32.xlu0 %v362_v33 }
  0xee   : > { %371 = vadd.xlane.f32.xlu0 %v364_v34 }
 0x167   : > { %v347_v37 = vpop.xlane.xlu0 %346  ;;  %v343_v38 = vpop.xlane.xlu1 %342 }
 0x168   : > { %v351_v39 = vadd.f32 %v347_v37, %v339_v35  ;;  %v349_v40 = vadd.f32 %v343_v38, %v337_v36 }
 0x16a   : > { %356 = vst.msk [vmem:[%s618_s3 + $0x18] sm:$0xff] %vm352_vm4, %v351_v39  ;;  %354 = vst.msk [vmem:[%s618_s3 + $0x8] sm:$0xff] %vm352_vm4, %v349_v40 }
 0x16b   : > { %v341_v43 = vpop.xlane.xlu0 %340  ;;  %v366_v44 = vpop.xlane.xlu1 %365 }
 0x16c   : > { %v348_v45 = vadd.f32 %v341_v43, %v336_v41  ;;  %v373_v46 = vadd.f32 %v366_v44, %v357_v42 }
 0x16e   : > { %353 = vst.msk [vmem:[%s618_s3] sm:$0xff] %vm352_vm4, %v348_v45  ;;  %377 = vst.msk [vmem:[%s619_s4] sm:$0xff] %vm352_vm4, %v373_v46 }
 0x16f   : > { %v345_v49 = vpop.xlane.xlu0 %344  ;;  %v370_v50 = vpop.xlane.xlu1 %369 }
 0x170   : > { %v350_v51 = vadd.f32 %v345_v49, %v338_v47  ;;  %v375_v52 = vadd.f32 %v370_v50, %v359_v48 }
 0x172   : > { %355 = vst.msk [vmem:[%s618_s3 + $0x10] sm:$0xff] %vm352_vm4, %v350_v51  ;;  %379 = vst.msk [vmem:[%s619_s4 + $0x10] sm:$0xff] %vm352_vm4, %v375_v52 }
 0x173   : > { %v368_v54 = vpop.xlane.xlu0 %367 }
 0x174   : > { %v374_v55 = vadd.f32 %v368_v54, %v358_v53 }
 0x176   : > { %378 = vst.msk [vmem:[%s619_s4 + $0x8] sm:$0xff] %vm352_vm4, %v374_v55 }
 0x177   : > { %v372_v57 = vpop.xlane.xlu0 %371 }
 0x178   : > { %v376_v58 = vadd.f32 %v372_v57, %v360_v56 }
 0x17a   : > { %380 = vst.msk [vmem:[%s619_s4 + $0x18] sm:$0xff] %vm352_vm4, %v376_v58 }
 0x17b PF: > { %s15_s15 = sadd.s32 1, %s462_s15  }
 0x17c   : > { %p12_p5 = scmp.ge.s32.totalorder %s15_s15, 6  }
 0x17e   :  { %14 = sbr.rel (!%p12_p5) target bundleno = 1 (0x1), region = 70 }

</bundles_post_ra>
